<compile_context>
chip_gen: v7x
topology: tpu7x:2x2x1
jax: 0.10.0
libtpu: 0.0.40
codegen_flags: <defaults>
</compile_context>

<pallas_src>
import functools

import jax
import jax.numpy as jnp
from jax.experimental import pallas as pl
from jax.experimental.pallas import tpu as pltpu


def _quantile_kernel(num_actions, quantiles,
                     x_ref,
                     wf_ref, bf_ref,
                     w1_ref, b1_ref,
                     w2_ref, b2_ref,
                     out_ref):
    """Fused dueling quantile head for one batch tile.

    feat = relu(x @ Wf + bf)                                  [TB, H]
    h    = relu(feat @ [Wa1 | Wv1] + [ba1 | bv1])             [TB, 2H]
    y    = h @ blockdiag(Wa2_centered, Wv2) + [ba2_c | bv2]   [TB, A*Q + Q]
    out  = y[:, :A*Q] + tile(y[:, A*Q:], A)                   [TB, A*Q]
    (the dueling "- mean_a(adv)" is already folded into Wa2_centered / ba2_centered)
    """
    aq = num_actions * quantiles

    x = x_ref[...]

    # Feature layer: Linear + ReLU
    feat = jnp.dot(x, wf_ref[...], preferred_element_type=jnp.float32) + bf_ref[...]
    feat = jnp.maximum(feat, 0.0)

    # Fused advantage/value hidden layer: one matmul, one ReLU.
    h = jnp.dot(feat, w1_ref[...], preferred_element_type=jnp.float32) + b1_ref[...]
    h = jnp.maximum(h, 0.0)

    # Fused (block-diagonal) output layer: [adv_centered | value] in one MXU push.
    y = jnp.dot(h, w2_ref[...], preferred_element_type=jnp.float32) + b2_ref[...]

    adv_c = y[:, :aq]                      # [TB, A*Q], already mean-centered over actions
    val = y[:, aq:aq + quantiles]          # [TB, Q]

    # Single full-width lane-dense store.
    out_ref[...] = adv_c + jnp.concatenate([val] * num_actions, axis=1)


def prepare_fused_params(p, *, num_actions, quantiles):
    """One-time host/XLA-side weight preprocessing (fusion + dueling-mean fold)."""
    hidden = p["wa1"].shape[0]
    aq = num_actions * quantiles

    # Fuse the two branch-hidden Linears.
    w1 = jnp.concatenate([p["wa1"], p["wv1"]], axis=1)          # (H, 2H)
    b1 = jnp.concatenate([p["ba1"], p["bv1"]], axis=1)          # (1, 2H)

    # Fold the dueling mean: center wa2/ba2 over the action axis per quantile.
    wa2 = p["wa2"].reshape(hidden, num_actions, quantiles)
    wa2_c = (wa2 - wa2.mean(axis=1, keepdims=True)).reshape(hidden, aq)
    ba2 = p["ba2"].reshape(1, num_actions, quantiles)
    ba2_c = (ba2 - ba2.mean(axis=1, keepdims=True)).reshape(1, aq)

    # Block-diagonal output weight so [ah | vh] @ w2 = [adv_centered | value].
    w2 = jnp.concatenate(
        [
            jnp.concatenate([wa2_c, jnp.zeros((hidden, quantiles), jnp.float32)], axis=1),
            jnp.concatenate([jnp.zeros((hidden, aq), jnp.float32), p["wv2"]], axis=1),
        ],
        axis=0,
    )                                                           # (2H, A*Q + Q)
    b2 = jnp.concatenate([ba2_c, p["bv2"]], axis=1)             # (1, A*Q + Q)

    return dict(wf=p["wf"], bf=p["bf"], w1=w1, b1=b1, w2=w2, b2=b2)


def quantile_network_forward(x, params, *, num_actions, quantiles, block_batch=128):
    """Run the QuantileNetwork forward pass. Returns [B, num_actions, quantiles]."""
    B, in_size = x.shape
    hidden = params["wf"].shape[1]
    aq = num_actions * quantiles

    fp = prepare_fused_params(params, num_actions=num_actions, quantiles=quantiles)

    tb = min(block_batch, B)
    grid = (pl.cdiv(B, tb),)

    kernel = functools.partial(_quantile_kernel, num_actions, quantiles)

    def batch_spec(cols):
        # Blocked along batch; weights below use a constant index_map (VMEM-resident).
        return pl.BlockSpec((tb, cols), lambda i: (i, 0))

    def resident_spec(arr):
        return pl.BlockSpec(arr.shape, lambda i: (0, 0))

    in_specs = [
        batch_spec(in_size),                 # x
        resident_spec(fp["wf"]), resident_spec(fp["bf"]),
        resident_spec(fp["w1"]), resident_spec(fp["b1"]),
        resident_spec(fp["w2"]), resident_spec(fp["b2"]),
    ]
    out_specs = batch_spec(aq)

    weight_bytes = 4 * sum(int(fp[k].size) for k in ("wf", "bf", "w1", "b1", "w2", "b2"))
    cost = pl.CostEstimate(
        flops=2 * B * (in_size * hidden + hidden * 2 * hidden + 2 * hidden * (aq + quantiles)),
        transcendentals=0,
        bytes_accessed=4 * (x.size + B * aq) + weight_bytes,
    )

    flat = pl.pallas_call(
        kernel,
        out_shape=jax.ShapeDtypeStruct((B, aq), jnp.float32),
        grid=grid,
        in_specs=in_specs,
        out_specs=out_specs,
        compiler_params=pltpu.CompilerParams(
            dimension_semantics=("parallel",),
            vmem_limit_bytes=32 * 1024 * 1024,
        ),
        cost_estimate=cost,
    )(
        x,
        fp["wf"], fp["bf"],
        fp["w1"], fp["b1"],
        fp["w2"], fp["b2"],
    )

    # Matches PyTorch: adv.view(-1, A, Q) with the flat layer output being action-major.
    return flat.reshape(B, num_actions, quantiles)


def init_params(key, in_size, hidden_size, num_actions, quantiles):
    """Deterministic synthetic parameters (PyTorch-style uniform fan-in init)."""
    ks = jax.random.split(key, 10)

    def linear(kw, kb, fan_in, fan_out):
        bound = 1.0 / jnp.sqrt(fan_in)
        w = jax.random.uniform(kw, (fan_in, fan_out), jnp.float32, -bound, bound)
        b = jax.random.uniform(kb, (1, fan_out), jnp.float32, -bound, bound)
        return w, b

    wf, bf = linear(ks[0], ks[1], in_size, hidden_size)
    wa1, ba1 = linear(ks[2], ks[3], hidden_size, hidden_size)
    wa2, ba2 = linear(ks[4], ks[5], hidden_size, num_actions * quantiles)
    wv1, bv1 = linear(ks[6], ks[7], hidden_size, hidden_size)
    wv2, bv2 = linear(ks[8], ks[9], hidden_size, quantiles)
    return dict(wf=wf, bf=bf, wa1=wa1, ba1=ba1, wa2=wa2, ba2=ba2,
                wv1=wv1, bv1=bv1, wv2=wv2, bv2=bv2)


def reference_forward(x, p, *, num_actions, quantiles):
    """Plain-JAX reference reproducing the PyTorch module semantics."""
    feat = jax.nn.relu(x @ p["wf"] + p["bf"])
    adv = jax.nn.relu(feat @ p["wa1"] + p["ba1"]) @ p["wa2"] + p["ba2"]
    val = jax.nn.relu(feat @ p["wv1"] + p["bv1"]) @ p["wv2"] + p["bv2"]
    adv = adv.reshape(-1, num_actions, quantiles)
    val = val.reshape(-1, 1, quantiles)
    return val + adv - adv.mean(axis=1, keepdims=True)


if __name__ == "__main__":
    B, IN_SIZE, HIDDEN, NUM_ACTIONS, QUANTILES = 64, 16, 32, 4, 32

    key = jax.random.PRNGKey(0)
    k_x, k_p = jax.random.split(key)
    x = jax.random.normal(k_x, (B, IN_SIZE), jnp.float32)
    params = init_params(k_p, IN_SIZE, HIDDEN, NUM_ACTIONS, QUANTILES)

    out = quantile_network_forward(x, params, num_actions=NUM_ACTIONS, quantiles=QUANTILES)
    out = jax.block_until_ready(out)

    ref = reference_forward(x, params, num_actions=NUM_ACTIONS, quantiles=QUANTILES)
    assert out.shape == (B, NUM_ACTIONS, QUANTILES)
    # Weight-folded dueling mean is mathematically identical; allow f32 rounding slack.
    assert jnp.allclose(out, ref, atol=1e-4, rtol=1e-4)

    print("KERNEL_OK")
</pallas_src>

<mosaic_0001>
module attributes {stable_mosaic.version = 11 : i64} {
  func.func @_quantile_kernel(%arg0: i32, %arg1: memref<64x16xf32, #tpu.memory_space<vmem>>, %arg2: memref<16x32xf32, #tpu.memory_space<vmem>>, %arg3: memref<1x32xf32, #tpu.memory_space<vmem>>, %arg4: memref<32x64xf32, #tpu.memory_space<vmem>>, %arg5: memref<1x64xf32, #tpu.memory_space<vmem>>, %arg6: memref<64x160xf32, #tpu.memory_space<vmem>>, %arg7: memref<1x160xf32, #tpu.memory_space<vmem>>, %arg8: memref<64x128xf32, #tpu.memory_space<vmem>>) attributes {dimension_semantics = [#tpu.dimension_semantics<parallel>], iteration_bounds = array<i64: 1>, scalar_prefetch = 0 : i64, scratch_operands = 0 : i64, tpu.core_type = #tpu.core_type<tc>, window_params = [{transform_indices = @transform_0, window_bounds = array<i64: 64, 16>}, {pipeline_mode = #tpu.pipeline_mode<synchronous>, transform_indices = @transform_1, window_bounds = array<i64: 16, 32>}, {pipeline_mode = #tpu.pipeline_mode<synchronous>, transform_indices = @transform_2, window_bounds = array<i64: 1, 32>}, {pipeline_mode = #tpu.pipeline_mode<synchronous>, transform_indices = @transform_3, window_bounds = array<i64: 32, 64>}, {pipeline_mode = #tpu.pipeline_mode<synchronous>, transform_indices = @transform_4, window_bounds = array<i64: 1, 64>}, {pipeline_mode = #tpu.pipeline_mode<synchronous>, transform_indices = @transform_5, window_bounds = array<i64: 64, 160>}, {pipeline_mode = #tpu.pipeline_mode<synchronous>, transform_indices = @transform_6, window_bounds = array<i64: 1, 160>}, {transform_indices = @transform_7, window_bounds = array<i64: 64, 128>}]} {
    %c0 = arith.constant 0 : index
    %c0_0 = arith.constant 0 : index
    %0 = vector.load %arg1[%c0, %c0_0] : memref<64x16xf32, #tpu.memory_space<vmem>>, vector<64x16xf32>
    %c0_1 = arith.constant 0 : index
    %c0_2 = arith.constant 0 : index
    %1 = vector.load %arg2[%c0_1, %c0_2] : memref<16x32xf32, #tpu.memory_space<vmem>>, vector<16x32xf32>
    %cst = arith.constant dense<0.000000e+00> : vector<64x32xf32>
    %2 = tpu.matmul %0, %1, %cst {dimension_numbers = #tpu.dot_dimension_numbers<[1], [0], [0], [1], [0, 0, 1, 1], [], []>} : vector<64x16xf32>, vector<16x32xf32>, vector<64x32xf32> -> vector<64x32xf32>
    %c0_3 = arith.constant 0 : index
    %c0_4 = arith.constant 0 : index
    %3 = vector.load %arg3[%c0_3, %c0_4] : memref<1x32xf32, #tpu.memory_space<vmem>>, vector<1x32xf32>
    %4 = vector.broadcast %3 : vector<1x32xf32> to vector<64x32xf32>
    %5 = arith.addf %2, %4 : vector<64x32xf32>
    %cst_5 = arith.constant 0.000000e+00 : f32
    %6 = vector.broadcast %cst_5 : f32 to vector<64x32xf32>
    %7 = arith.maximumf %5, %6 : vector<64x32xf32>
    %c0_6 = arith.constant 0 : index
    %c0_7 = arith.constant 0 : index
    %8 = vector.load %arg4[%c0_6, %c0_7] : memref<32x64xf32, #tpu.memory_space<vmem>>, vector<32x64xf32>
    %cst_8 = arith.constant dense<0.000000e+00> : vector<64x64xf32>
    %9 = tpu.matmul %7, %8, %cst_8 {dimension_numbers = #tpu.dot_dimension_numbers<[1], [0], [0], [1], [0, 0, 1, 1], [], []>} : vector<64x32xf32>, vector<32x64xf32>, vector<64x64xf32> -> vector<64x64xf32>
    %c0_9 = arith.constant 0 : index
    %c0_10 = arith.constant 0 : index
    %10 = vector.load %arg5[%c0_9, %c0_10] : memref<1x64xf32, #tpu.memory_space<vmem>>, vector<1x64xf32>
    %11 = vector.broadcast %10 : vector<1x64xf32> to vector<64x64xf32>
    %12 = arith.addf %9, %11 : vector<64x64xf32>
    %cst_11 = arith.constant 0.000000e+00 : f32
    %13 = vector.broadcast %cst_11 : f32 to vector<64x64xf32>
    %14 = arith.maximumf %12, %13 : vector<64x64xf32>
    %c0_12 = arith.constant 0 : index
    %c0_13 = arith.constant 0 : index
    %15 = vector.load %arg6[%c0_12, %c0_13] : memref<64x160xf32, #tpu.memory_space<vmem>>, vector<64x160xf32>
    %cst_14 = arith.constant dense<0.000000e+00> : vector<64x160xf32>
    %16 = tpu.matmul %14, %15, %cst_14 {dimension_numbers = #tpu.dot_dimension_numbers<[1], [0], [0], [1], [0, 0, 1, 1], [], []>} : vector<64x64xf32>, vector<64x160xf32>, vector<64x160xf32> -> vector<64x160xf32>
    %c0_15 = arith.constant 0 : index
    %c0_16 = arith.constant 0 : index
    %17 = vector.load %arg7[%c0_15, %c0_16] : memref<1x160xf32, #tpu.memory_space<vmem>>, vector<1x160xf32>
    %18 = vector.broadcast %17 : vector<1x160xf32> to vector<64x160xf32>
    %19 = arith.addf %16, %18 : vector<64x160xf32>
    %20 = vector.extract_strided_slice %19 {offsets = [0, 0], sizes = [64, 128], strides = [1, 1]} : vector<64x160xf32> to vector<64x128xf32>
    %21 = vector.extract_strided_slice %19 {offsets = [0, 128], sizes = [64, 32], strides = [1, 1]} : vector<64x160xf32> to vector<64x32xf32>
    %22 = tpu.concatenate %21, %21, %21, %21 in 1 : vector<64x32xf32>, vector<64x32xf32>, vector<64x32xf32>, vector<64x32xf32> -> vector<64x128xf32>
    %23 = arith.addf %20, %22 : vector<64x128xf32>
    %c0_17 = arith.constant 0 : index
    %c0_18 = arith.constant 0 : index
    %24 = vector.load %arg8[%c0_17, %c0_18] : memref<64x128xf32, #tpu.memory_space<vmem>>, vector<64x128xf32>
    tpu.vector_store %arg8[%c0_17, %c0_18], %23 {strides = array<i32>} : memref<64x128xf32, #tpu.memory_space<vmem>>, vector<64x128xf32>,
    return
  }
  func.func @transform_0(%arg0: i32) -> (i32, i32) {
    %c0_i32 = arith.constant 0 : i32
    %c0_i32_0 = arith.constant 0 : i32
    return %arg0, %c0_i32 : i32, i32
  }
  func.func @transform_1(%arg0: i32) -> (i32, i32) {
    %c0_i32 = arith.constant 0 : i32
    %c0_i32_0 = arith.constant 0 : i32
    %c0_i32_1 = arith.constant 0 : i32
    return %c0_i32, %c0_i32_0 : i32, i32
  }
  func.func @transform_2(%arg0: i32) -> (i32, i32) {
    %c0_i32 = arith.constant 0 : i32
    %c0_i32_0 = arith.constant 0 : i32
    %c0_i32_1 = arith.constant 0 : i32
    return %c0_i32, %c0_i32_0 : i32, i32
  }
  func.func @transform_3(%arg0: i32) -> (i32, i32) {
    %c0_i32 = arith.constant 0 : i32
    %c0_i32_0 = arith.constant 0 : i32
    %c0_i32_1 = arith.constant 0 : i32
    return %c0_i32, %c0_i32_0 : i32, i32
  }
  func.func @transform_4(%arg0: i32) -> (i32, i32) {
    %c0_i32 = arith.constant 0 : i32
    %c0_i32_0 = arith.constant 0 : i32
    %c0_i32_1 = arith.constant 0 : i32
    return %c0_i32, %c0_i32_0 : i32, i32
  }
  func.func @transform_5(%arg0: i32) -> (i32, i32) {
    %c0_i32 = arith.constant 0 : i32
    %c0_i32_0 = arith.constant 0 : i32
    %c0_i32_1 = arith.constant 0 : i32
    return %c0_i32, %c0_i32_0 : i32, i32
  }
  func.func @transform_6(%arg0: i32) -> (i32, i32) {
    %c0_i32 = arith.constant 0 : i32
    %c0_i32_0 = arith.constant 0 : i32
    %c0_i32_1 = arith.constant 0 : i32
    return %c0_i32, %c0_i32_0 : i32, i32
  }
  func.func @transform_7(%arg0: i32) -> (i32, i32) {
    %c0_i32 = arith.constant 0 : i32
    %c0_i32_0 = arith.constant 0 : i32
    return %arg0, %c0_i32 : i32, i32
  }
}

</mosaic_0001>

<bundles_post_ra>
// kernel: tpu_custom_call.1
= control target key start
LH: loop header
LB: loop body
LE: loop exit
PB: predicated region body
PF: predicated region fallthrough
CT: control target
= control target key end

     0   :  { %12 = vsyncpa [#allocation3], 0  ;;  %s1073_s0 = inlined_call_operand.vmem [shape: f32[64,16], index: 0, kind: input, shape index: {}]   ;;  %s1074_s1 = inlined_call_operand.vmem [shape: f32[16,32], index: 1, kind: input, shape index: {}]   ;;  %s1075_s2 = inlined_call_operand.vmem [shape: f32[1,32], index: 2, kind: input, shape index: {}]   ;;  %s1076_s3 = inlined_call_operand.vmem [shape: f32[32,64], index: 3, kind: input, shape index: {}]   ;;  %s1077_s4 = inlined_call_operand.vmem [shape: f32[1,64], index: 4, kind: input, shape index: {}]   ;;  %s1078_s5 = inlined_call_operand.hbm [shape: f32[64,160], index: 5, kind: input, shape index: {}]   ;;  %s1079_s6 = inlined_call_operand.vmem [shape: f32[1,160], index: 6, kind: input, shape index: {}]   ;;  %s1080_s7 = inlined_call_operand.hbm [shape: f32[64,128], index: 7, kind: output, shape index: {}]  }
   0x1   :  { %13 = vsyncpa [#allocation4], 0  ;;  %s827_s24 = smov [#allocation2]   ;;  %s779_s28 = scalar_lea.hbm %s1078_s5, 2048 }
   0x2   :  { %s29_s25 = sshll.u32 %s827_s24, 4  ;;  %p780_p0 = scmp.ne.s32.totalorder %s1078_s5, %s779_s28  ;;  %s30_s25 = int_to_ptr.vmem [resolvable:$true] %s29_s25 }
   0x3   :  { %p783_p1 = scmp.lt.u32.totalorder %s779_s28, %s1078_s5 }
   0x5   :  { %p785_p2 = pnand %p783_p1, %p780_p0 }
   0x7   :  { %788 = shalt.err (!%p785_p2)
}
   0x8   :  { %s789_s10 = scalar_lea.vmem %s30_s25, 2048  ;;  %p794_p4 = scmp.lt.s32.totalorder %s30_s25, %s30_s25 }
   0x9   :  { %p790_p3 = scmp.ne.s32.totalorder %s30_s25, %s789_s10  ;;  %p795_p5 = scmp.lt.s32.totalorder %s789_s10, %s789_s10 }
   0xb   :  { %p796_p6 = por %p795_p5, %p794_p4 }
   0xd   :  { %p797_p7 = pnand %p796_p6, %p790_p3 }
   0xf   :  { %800 = shalt.err (!%p797_p7)
}
  0x10   :  { %s828_s11 = smov 256   ;;  %s829_s12 = smov 16  }
  0x11   :  { %35 = dma.hbm_to_vmem [thread:$0]  %s1078_s5, 2048, %s30_s25, [#allocation3], %s828_s11, %s828_s11, %s829_s12  }
  0x12   :  { %823 = dma.done.wait [#allocation3], 2048  }
  0x13   :  { %824 = vsyncadd [#allocation3], 4294965248  ;;  %vm58_vm0 = vcmask 130048   ;;  %v49_v0 = vld [vmem:[%s1074_s1] sm:$0xff]  ;;  %v50_v1 = vld [vmem:[%s1074_s1 + $0x8] sm:$0xff]  ;;  %vm207_vm1 = vcmask 261120  }
  0x14   :  { %v41_v2 = vld [vmem:[%s1073_s0] sm:$0xff]  ;;  %v733_v3 = vpack.c.bf16 %v50_v1, %v49_v0  ;;  %v197_v5 = vld [vmem:[%s1076_s3 + $0x8] sm:$0xff]  ;;  %v43_v8 = vld [vmem:[%s1073_s0 + $0x10] sm:$0xff]  ;;  %vm373_vm2 = vcmask 523264   ;;  %s831_s20 = smov 32   ;;  %s832_s5 = smov 64  }
  0x15   :  { %701 = vmatprep.mubr.msk.f32.mxu0 %vm58_vm0, %v41_v2  ;;  %v196_v4 = vld [vmem:[%s1076_s3] sm:$0xff]  ;;  %v42_v6 = vld [vmem:[%s1073_s0 + $0x8] sm:$0xff]  ;;  %v44_v9 = vld [vmem:[%s1073_s0 + $0x18] sm:$0xff]  ;;  %v830_v2 = vmov 0.0   ;;  %vm607_vm3 = vcmask 785408   ;;  %s834_s21 = smov [#allocation5]  }
  0x16   :  { %734 = vmatprep.subr.bf16.mxu0 %v733_v3  ;;  %v737_v7 = vpack.c.bf16 %v197_v5, %v196_v4  ;;  %v45_v10 = vld [vmem:[%s1073_s0 + $0x20] sm:$0xff]  ;;  %v46_v11 = vld [vmem:[%s1073_s0 + $0x28] sm:$0xff]  ;;  %v47_v12 = vld [vmem:[%s1073_s0 + $0x30] sm:$0xff]  ;;  %s637_s22 = sshll.u32 %s834_s21, 4  ;;  %s638_s22 = int_to_ptr.vmem [resolvable:$true] %s637_s22 }
  0x17   :  { %736 = vmatpush3.bf16.msra.mxu0 %v733_v3  ;;  %v48_v13 = vld [vmem:[%s1073_s0 + $0x38] sm:$0xff]  ;;  %v198_v14 = vld [vmem:[%s1076_s3 + $0x10] sm:$0xff]  ;;  %v346_v17 = vld [vmem:[#allocation2 + $0x8] sm:$0xff]  ;;  %s801_s23 = scalar_lea.vmem %s638_s22, 1024  ;;  %p806_p9 = scmp.lt.s32.totalorder %s638_s22, %s638_s22 }
  0x18   :  { %738 = vmatprep.subr.bf16.mxu1 %v737_v7  ;;  %v199_v15 = vld [vmem:[%s1076_s3 + $0x18] sm:$0xff]  ;;  %v345_v19 = vld [vmem:[#allocation2] sm:$0xff]  ;;  %v347_v21 = vld [vmem:[#allocation2 + $0x10] sm:$0xff]  ;;  %p802_p8 = scmp.ne.s32.totalorder %s638_s22, %s801_s23  ;;  %p807_p10 = scmp.lt.s32.totalorder %s801_s23, %s801_s23 }
  0x19   :  { %740 = vmatpush3.bf16.msra.mxu1 %v737_v7  ;;  %v741_v16 = vpack.c.bf16 %v199_v15, %v198_v14  ;;  %v348_v18 = vld [vmem:[#allocation2 + $0x18] sm:$0xff]  ;;  %v350_v22 = vld [vmem:[#allocation2 + $0x28] sm:$0xff]  ;;  %v747_v24 = vpack.c.bf16 %v347_v21, %v345_v19  ;;  %v349_v26 = vld [vmem:[#allocation2 + $0x20] sm:$0xff] }
  0x1a   :  { %702 = vmatmul.mubr.msk.f32.vlgmr.msra.gmra.mrb[0].mxu0 %vm58_vm0, %v42_v6  ;;  %v745_v20 = vpack.c.bf16 %v348_v18, %v346_v17  ;;  %v352_v23 = vld [vmem:[#allocation2 + $0x38] sm:$0xff]  ;;  %v351_v27 = vld [vmem:[#allocation2 + $0x30] sm:$0xff]  ;;  %v354_v28 = vld [vmem:[#allocation2 + $0x48] sm:$0xff]  ;;  %p808_p11 = por %p807_p10, %p806_p9 }
  0x1b   :  { %704 = vmatprep.mubr.msk.f32.mxu0 %vm58_vm0, %v43_v8  ;;  %742 = vmatprep.subr.bf16.mxu1 %v741_v16  ;;  %v749_v25 = vpack.c.bf16 %v352_v23, %v350_v22  ;;  %v356_v29 = vld [vmem:[#allocation2 + $0x58] sm:$0xff]  ;;  %v751_v30 = vpack.c.bf16 %v351_v27, %v349_v26  ;;  %v353_v32 = vld [vmem:[#allocation2 + $0x40] sm:$0xff]  ;;  %v355_v33 = vld [vmem:[#allocation2 + $0x50] sm:$0xff] }
  0x1c   :  { %746 = vmatprep.subr.bf16.mxu0 %v745_v20  ;;  %v753_v31 = vpack.c.bf16 %v356_v29, %v354_v28  ;;  %v755_v34 = vpack.c.bf16 %v355_v33, %v353_v32  ;;  %v649_v35 = vld [vmem:[%s1075_s2] ss:$0 sm:$0xff]  ;;  %v358_v60 = vld [vmem:[#allocation2 + $0x68] sm:$0xff]  ;;  %v360_v61 = vld [vmem:[#allocation2 + $0x78] sm:$0xff]  ;;  %v363_v28 = vlaneseq  ;;  %p809_p12 = pnand %p808_p11, %p802_p8 }
  0x1d   :  { %744 = vmatpush3.bf16.msra.mxu1 %v741_v16  ;;  %748 = vmatpush1.bf16.msra.mxu0 %v747_v24  ;;  %v757_v62 = vpack.c.bf16 %v360_v61, %v358_v60  ;;  %v357_v63 = vld [vmem:[#allocation2 + $0x60] sm:$0xff]  ;;  %v359_v0 = vld [vmem:[#allocation2 + $0x70] sm:$0xff] }
  0x1e   :  { %705 = vmatmul.mubr.msk.f32.gmra.mrb[2].mxu0 %vm58_vm0, %v44_v9  ;;  %761 = vmatprep.subr.bf16.mxu1 %v745_v20  ;;  %v759_v1 = vpack.c.bf16 %v359_v0, %v357_v63  ;;  %v658_v3 = vld [vmem:[%s1077_s4] ss:$0 sm:$0xff]  ;;  %v364_v29 = vshrl.u32 %v363_v28, 7 }
  0x1f   :  { %707 = vmatprep.mubr.msk.f32.mxu0 %vm58_vm0, %v45_v10  ;;  %750 = vmatprep.subr.bf16.mxu0 %v749_v25 }
  0x21   :  { %752 = vmatpush1.bf16.msra.mxu0 %v751_v30 }
  0x22   :  { %708 = vmatmul.mubr.msk.f32.gmra.mrb[4].mxu0 %vm58_vm0, %v46_v11  ;;  %754 = vmatprep.subr.bf16.mxu0 %v753_v31 }
  0x23   :  { %710 = vmatprep.mubr.msk.f32.mxu0 %vm58_vm0, %v47_v12 }
  0x25   :  { %756 = vmatpush1.bf16.msra.mxu0 %v755_v34 }
  0x26   :  { %711 = vmatmul.mubr.msk.f32.gmra.mrb[6].mxu0 %vm58_vm0, %v48_v13  ;;  %758 = vmatprep.subr.bf16.mxu0 %v757_v62 }
  0x27   :  { %462 = vmatprep.mubr.f32.mxu0 %v830_v2 }
  0x29   :  { %760 = vmatpush1.bf16.msra.mxu0 %v759_v1 }
  0xed   :  { %v703_v36 = vpop.f32.mrb[0].mxu0 }
  0xee   :  { %v155_v37 = vadd.f32 %v703_v36, %v649_v35  ;;  %v149_v38 = vpop.f32.mrb[1].mxu0 }
  0xef   :  { %v150_v39 = vadd.f32 %v649_v35, %v149_v38 }
  0xf0   :  { %v189_v42 = vmax.f32 %v155_v37, 0.0 }
  0xf1   :  { %v188_v40 = vmax.f32 %v150_v39, 0.0  ;;  %v706_v41 = vpop.f32.mrb[2].mxu0 }
  0xf2   :  { %v165_v43 = vadd.f32 %v706_v41, %v649_v35  ;;  %v159_v44 = vpop.f32.mrb[3].mxu0 }
  0xf3   :  { %721 = vmatprep.mubr.msk.f32.mxu1 %vm207_vm1, %v188_v40  ;;  %v160_v45 = vadd.f32 %v649_v35, %v159_v44 }
  0xf4   :  { %v191_v46 = vmax.f32 %v165_v43, 0.0  ;;  %722 = vmatmul.mubr.msk.f32.vlgmr.msra.gmra.mrb[0].mxu1 %vm207_vm1, %v189_v42 }
  0xf5   :  { %v190_v47 = vmax.f32 %v160_v45, 0.0  ;;  %v709_v48 = vpop.f32.mrb[4].mxu0  ;;  %765 = vmatpush1.bf16.msra.mxu1 %v747_v24 }
  0xf6   :  { %v175_v49 = vadd.f32 %v709_v48, %v649_v35  ;;  %v169_v50 = vpop.f32.mrb[5].mxu0  ;;  %762 = vmatprep.subr.bf16.mxu1 %v749_v25 }
  0xf7   :  { %v170_v51 = vadd.f32 %v649_v35, %v169_v50  ;;  %724 = vmatprep.mubr.msk.f32.mxu1 %vm207_vm1, %v190_v47 }
  0xf8   :  { %v193_v52 = vmax.f32 %v175_v49, 0.0  ;;  %725 = vmatmul.mubr.msk.f32.gmra.mrb[2].mxu1 %vm207_vm1, %v191_v46 }
  0xf9   :  { %v192_v53 = vmax.f32 %v170_v51, 0.0  ;;  %v712_v54 = vpop.f32.mrb[6].mxu0  ;;  %766 = vmatpush1.bf16.msra.mxu1 %v751_v30  ;;  %v369_v30 = vsub.s32 1, %v364_v29 }
  0xfa   :  { %v185_v55 = vadd.f32 %v712_v54, %v649_v35  ;;  %v179_v56 = vpop.f32.mrb[7].mxu0  ;;  %763 = vmatprep.subr.bf16.mxu1 %v753_v31  ;;  %v361_v31 = vld [vmem:[%s1079_s6] sm:$0x3]  ;;  %s833_s6 = smov 96  }
  0xfb   :  { %727 = vmatprep.mubr.msk.f32.mxu1 %vm207_vm1, %v192_v53  ;;  %v180_v57 = vadd.f32 %v649_v35, %v179_v56  ;;  %v370_v32 = vrot.slane %v361_v31, %v369_v30 }
  0xfc   :  { %728 = vmatmul.mubr.msk.f32.gmra.mrb[4].mxu1 %vm207_vm1, %v193_v52  ;;  %v195_v58 = vmax.f32 %v185_v55, 0.0 }
  0xfd   :  { %v194_v59 = vmax.f32 %v180_v57, 0.0  ;;  %767 = vmatpush1.bf16.msra.mxu1 %v755_v34  ;;  %v365_v57 = vsub.s32 0, %v364_v29 }
  0xfe   :  { %764 = vmatprep.subr.bf16.mxu1 %v757_v62 }
  0xff   :  { %730 = vmatprep.mubr.msk.f32.mxu1 %vm207_vm1, %v194_v59  ;;  %v1017_v59 = vrot.slane %v361_v31, %v365_v57 }
 0x100   :  { %731 = vmatmul.mubr.msk.f32.gmra.mrb[6].mxu1 %vm207_vm1, %v195_v58 }
 0x101   :  { %768 = vmatpush1.bf16.msra.mxu1 %v759_v1  ;;  %492 = vmatprep.mubr.f32.mxu1 %v830_v2 }
 0x1c7   :  { %v723_v4 = vpop.f32.mrb[0].mxu1 }
 0x1c8   :  { %v298_v5 = vpop.f32.mrb[1].mxu1  ;;  %v304_v7 = vadd.f32 %v723_v4, %v658_v3 }
 0x1c9   :  { %v299_v6 = vadd.f32 %v658_v3, %v298_v5 }
 0x1ca   :  { %v338_v11 = vmax.f32 %v304_v7, 0.0 }
 0x1cb   :  { %v337_v8 = vmax.f32 %v299_v6, 0.0  ;;  %v726_v9 = vpop.f32.mrb[2].mxu1 }
 0x1cc   :  { %v308_v10 = vpop.f32.mrb[3].mxu1  ;;  %v314_v17 = vadd.f32 %v726_v9, %v658_v3 }
 0x1cd   :  { %667 = vmatmul.mubr.msk.f32.vlgmr.msra.gmra.mrb[8].mxu0 %vm373_vm2, %v337_v8  ;;  %v309_v12 = vadd.f32 %v658_v3, %v308_v10 }
 0x1ce   :  { %468 = vmatprep.mubr.f32.mxu0 %v830_v2  ;;  %v340_v23 = vmax.f32 %v314_v17, 0.0 }
 0x1cf   :  { %v729_v13 = vpop.f32.mrb[4].mxu1  ;;  %v339_v18 = vmax.f32 %v309_v12, 0.0 }
 0x1d0   :  { %v324_v14 = vadd.f32 %v729_v13, %v658_v3  ;;  %v318_v15 = vpop.f32.mrb[5].mxu1 }
 0x1d1   :  { %668 = vmatmul.mubr.msk.f32.gmra.mrb[10].mxu0 %vm373_vm2, %v338_v11  ;;  %v319_v24 = vadd.f32 %v658_v3, %v318_v15 }
 0x1d2   :  { %v342_v16 = vmax.f32 %v324_v14, 0.0  ;;  %474 = vmatprep.mubr.f32.mxu0 %v830_v2 }
 0x1d3   :  { %v732_v19 = vpop.f32.mrb[6].mxu1  ;;  %v341_v27 = vmax.f32 %v319_v24, 0.0 }
 0x1d4   :  { %672 = vmatmul.mubr.msk.f32.vlgmr.msra.gmra.mrb[8].mxu1 %vm373_vm2, %v342_v16  ;;  %v328_v20 = vpop.f32.mrb[7].mxu1  ;;  %v334_v21 = vadd.f32 %v732_v19, %v658_v3 }
 0x1d5   :  { %669 = vmatmul.mubr.msk.f32.gmra.mrb[12].mxu0 %vm373_vm2, %v339_v18  ;;  %v329_v22 = vadd.f32 %v658_v3, %v328_v20  ;;  %498 = vmatprep.mubr.f32.mxu1 %v830_v2 }
 0x1d6   :  { %480 = vmatprep.mubr.f32.mxu0 %v830_v2  ;;  %v344_v26 = vmax.f32 %v334_v21, 0.0 }
 0x1d7   :  { %v343_v25 = vmax.f32 %v329_v22, 0.0 }
 0x1d9   :  { %670 = vmatmul.mubr.msk.f32.gmra.mrb[14].mxu0 %vm373_vm2, %v340_v23  ;;  %673 = vmatmul.mubr.msk.f32.gmra.mrb[10].mxu1 %vm373_vm2, %v343_v25 }
 0x1da   :  { %486 = vmatprep.mubr.f32.mxu0 %v830_v2  ;;  %504 = vmatprep.mubr.f32.mxu1 %v830_v2 }
 0x1dd   :  { %671 = vmatmul.mubr.msk.f32.gmra.mrb[16].mxu0 %vm373_vm2, %v341_v27  ;;  %674 = vmatmul.mubr.msk.f32.gmra.mrb[12].mxu1 %vm373_vm2, %v344_v26 }
 0x2a0   :  { %v464_v33 = vpop.f32.mrb[8].mxu0 }
 0x2a1   :  { %v466_v34 = vpop.f32.mrb[9].mxu0  ;;  %v465_v63 = vadd.f32 %v464_v33, %v1017_v59 }
 0x2a2   :  { %v467_v35 = vadd.f32 %v466_v34, %v370_v32 }
 0x2a4   :  { %v964_v36 = vpop.f32.mrb[10].mxu0  ;;  %519 = vrot.lane.b32.xlu0 %v467_v35, %s831_s20 }
 0x2a5   :  { %v472_v37 = vpop.f32.mrb[11].mxu0  ;;  %v471_v8 = vadd.f32 %v964_v36, %v1017_v59 }
 0x2a6   :  { %v473_v38 = vadd.f32 %v472_v37, %v370_v32 }
 0x2a7   :  { %v967_v39 = vpop.f32.mrb[8].mxu1 }
 0x2a8   :  { %v969_v40 = vpop.f32.mrb[12].mxu0  ;;  %545 = vrot.lane.b32.xlu1 %v473_v38, %s832_s5  ;;  %543 = vrot.lane.b32.xlu0 %v467_v35, %s832_s5  ;;  %v496_v41 = vpop.f32.mrb[9].mxu1  ;;  %v495_v15 = vadd.f32 %v967_v39, %v1017_v59 }
 0x2a9   :  { %v478_v42 = vpop.f32.mrb[13].mxu0  ;;  %v497_v47 = vadd.f32 %v496_v41, %v370_v32  ;;  %v477_v24 = vadd.f32 %v969_v40, %v1017_v59 }
 0x2aa   :  { %v479_v52 = vadd.f32 %v478_v42, %v370_v32 }
 0x2ac   :  { %v973_v43 = vpop.f32.mrb[14].mxu0  ;;  %569 = vrot.lane.b32.xlu1 %v473_v38, %s833_s6  ;;  %567 = vrot.lane.b32.xlu0 %v467_v35, %s833_s6  ;;  %v977_v44 = vpop.f32.mrb[10].mxu1 }
 0x2ad   :  { %v484_v45 = vpop.f32.mrb[15].mxu0  ;;  %v502_v46 = vpop.f32.mrb[11].mxu1  ;;  %v483_v33 = vadd.f32 %v973_v43, %v1017_v59 }
 0x2ae   :  { %v987_v53 = vadd.f32 %v502_v46, %v370_v32  ;;  %v485_v54 = vadd.f32 %v484_v45, %v370_v32 }
 0x2b0   :  { %v979_v48 = vpop.f32.mrb[16].mxu0  ;;  %529 = vrot.lane.b32.xlu1 %v497_v47, %s831_s20  ;;  %521 = vrot.lane.b32.xlu0 %v473_v38, %s831_s20  ;;  %v983_v49 = vpop.f32.mrb[12].mxu1 }
 0x2b1   :  { %v490_v50 = vpop.f32.mrb[17].mxu0  ;;  %v508_v51 = vpop.f32.mrb[13].mxu1  ;;  %v489_v40 = vadd.f32 %v979_v48, %v1017_v59 }
 0x2b2   :  { %v997_v55 = vadd.f32 %v490_v50, %v370_v32  ;;  %v1005_v56 = vadd.f32 %v508_v51, %v370_v32  ;;  %v501_v50 = vadd.f32 %v977_v44, %v1017_v59 }
 0x2b4   :  { %553 = vrot.lane.b32.xlu1 %v497_v47, %s832_s5  ;;  %547 = vrot.lane.b32.xlu0 %v479_v52, %s832_s5 }
 0x2b8   :  { %577 = vrot.lane.b32.xlu1 %v497_v47, %s833_s6  ;;  %571 = vrot.lane.b32.xlu0 %v479_v52, %s833_s6 }
 0x2bc   :  { %523 = vrot.lane.b32.xlu1 %v479_v52, %s831_s20  ;;  %531 = vrot.lane.b32.xlu0 %v987_v53, %s831_s20 }
 0x2c0   :  { %525 = vrot.lane.b32.xlu1 %v485_v54, %s831_s20  ;;  %555 = vrot.lane.b32.xlu0 %v987_v53, %s832_s5 }
 0x2c4   :  { %549 = vrot.lane.b32.xlu1 %v485_v54, %s832_s5  ;;  %527 = vrot.lane.b32.xlu0 %v997_v55, %s831_s20 }
 0x2c8   :  { %573 = vrot.lane.b32.xlu1 %v485_v54, %s833_s6  ;;  %551 = vrot.lane.b32.xlu0 %v997_v55, %s832_s5 }
 0x2cc   :  { %533 = vrot.lane.b32.xlu1 %v1005_v56, %s831_s20  ;;  %575 = vrot.lane.b32.xlu0 %v997_v55, %s833_s6 }
 0x2d0   :  { %557 = vrot.lane.b32.xlu1 %v1005_v56, %s832_s5  ;;  %579 = vrot.lane.b32.xlu0 %v987_v53, %s833_s6 }
 0x2d4   :  { %581 = vrot.lane.b32.xlu1 %v1005_v56, %s833_s6 }
 0x316   :  { %v520_v58 = vpop.permute.xlu0 %519 }
 0x317   :  { %v591_v62 = vsel %vm207_vm1, %v467_v35, %v520_v58  ;;  %v507_v58 = vadd.f32 %v983_v49, %v1017_v59 }
 0x31a   :  { %v546_v60 = vpop.permute.xlu1 %545  ;;  %v544_v61 = vpop.permute.xlu0 %543 }
 0x31b   :  { %v599_v0 = vsel %vm373_vm2, %v591_v62, %v544_v61 }
 0x31e   :  { %v570_v1 = vpop.permute.xlu1 %569  ;;  %v568_v2 = vpop.permute.xlu0 %567 }
 0x31f   :  { %v608_v3 = vsel %vm607_vm3, %v599_v0, %v568_v2 }
 0x320   :  { %v616_v4 = vadd.f32 %v608_v3, %v465_v63 }
 0x322   :  { %624 = vst [vmem:[#allocation5] sm:$0xff] %v616_v4  ;;  %v530_v5 = vpop.permute.xlu1 %529  ;;  %v522_v6 = vpop.permute.xlu0 %521 }
 0x323   :  { %v592_v7 = vsel %vm207_vm1, %v473_v38, %v522_v6  ;;  %v596_v14 = vsel %vm207_vm1, %v497_v47, %v530_v5 }
 0x324   :  { %v600_v9 = vsel %vm373_vm2, %v592_v7, %v546_v60 }
 0x325   :  { %v609_v10 = vsel %vm607_vm3, %v600_v9, %v570_v1 }
 0x326   :  { %v617_v11 = vadd.f32 %v609_v10, %v471_v8  ;;  %v554_v12 = vpop.permute.xlu1 %553  ;;  %v548_v13 = vpop.permute.xlu0 %547 }
 0x327   :  { %v604_v16 = vsel %vm373_vm2, %v596_v14, %v554_v12 }
 0x328   :  { %625 = vst [vmem:[#allocation5 + $0x8] sm:$0xff] %v617_v11 }
 0x32a   :  { %v578_v17 = vpop.permute.xlu1 %577  ;;  %v572_v18 = vpop.permute.xlu0 %571 }
 0x32b   :  { %v613_v19 = vsel %vm607_vm3, %v604_v16, %v578_v17 }
 0x32c   :  { %v621_v20 = vadd.f32 %v613_v19, %v495_v15 }
 0x32e   :  { %629 = vst [vmem:[#allocation5 + $0x28] sm:$0xff] %v621_v20  ;;  %v524_v21 = vpop.permute.xlu1 %523  ;;  %v532_v22 = vpop.permute.xlu0 %531 }
 0x32f   :  { %v593_v23 = vsel %vm207_vm1, %v479_v52, %v524_v21  ;;  %v597_v47 = vsel %vm207_vm1, %v987_v53, %v532_v22 }
 0x330   :  { %v601_v25 = vsel %vm373_vm2, %v593_v23, %v548_v13 }
 0x331   :  { %v610_v26 = vsel %vm607_vm3, %v601_v25, %v572_v18 }
 0x332   :  { %v618_v27 = vadd.f32 %v610_v26, %v477_v24  ;;  %v526_v28 = vpop.permute.xlu1 %525  ;;  %v556_v29 = vpop.permute.xlu0 %555 }
 0x333   :  { %v594_v32 = vsel %vm207_vm1, %v485_v54, %v526_v28  ;;  %v605_v51 = vsel %vm373_vm2, %v597_v47, %v556_v29 }
 0x334   :  { %626 = vst [vmem:[#allocation5 + $0x10] sm:$0xff] %v618_v27 }
 0x336   :  { %v550_v30 = vpop.permute.xlu1 %549  ;;  %v528_v31 = vpop.permute.xlu0 %527 }
 0x337   :  { %v602_v34 = vsel %vm373_vm2, %v594_v32, %v550_v30  ;;  %v595_v39 = vsel %vm207_vm1, %v997_v55, %v528_v31 }
 0x33a   :  { %v574_v35 = vpop.permute.xlu1 %573  ;;  %v552_v36 = vpop.permute.xlu0 %551 }
 0x33b   :  { %v611_v37 = vsel %vm607_vm3, %v602_v34, %v574_v35  ;;  %v603_v41 = vsel %vm373_vm2, %v595_v39, %v552_v36 }
 0x33c   :  { %v619_v38 = vadd.f32 %v611_v37, %v483_v33 }
 0x33e   :  { %627 = vst [vmem:[#allocation5 + $0x18] sm:$0xff] %v619_v38  ;;  %v534_v42 = vpop.permute.xlu1 %533  ;;  %v576_v45 = vpop.permute.xlu0 %575 }
 0x33f   :  { %v612_v43 = vsel %vm607_vm3, %v603_v41, %v576_v45  ;;  %v598_v57 = vsel %vm207_vm1, %v1005_v56, %v534_v42 }
 0x340   :  { %v620_v46 = vadd.f32 %v612_v43, %v489_v40 }
 0x342   :  { %628 = vst [vmem:[#allocation5 + $0x20] sm:$0xff] %v620_v46  ;;  %v558_v52 = vpop.permute.xlu1 %557  ;;  %v580_v54 = vpop.permute.xlu0 %579 }
 0x343   :  { %v614_v48 = vsel %vm607_vm3, %v605_v51, %v580_v54  ;;  %v606_v53 = vsel %vm373_vm2, %v598_v57, %v558_v52 }
 0x344   :  { %v622_v55 = vadd.f32 %v614_v48, %v501_v50 }
 0x346   :  { %630 = vst [vmem:[#allocation5 + $0x30] sm:$0xff] %v622_v55  ;;  %v582_v44 = vpop.permute.xlu1 %581 }
 0x347   :  { %v615_v60 = vsel %vm607_vm3, %v606_v53, %v582_v44 }
 0x348   :  { %v623_v61 = vadd.f32 %v615_v60, %v507_v58 }
 0x34a   :  { %631 = vst [vmem:[#allocation5 + $0x38] sm:$0xff] %v623_v61 }
 0x34b   :  { %812 = shalt.err (!%p809_p12)
}
 0x34c   :  { %s813_s1 = scalar_lea.hbm %s1080_s7, 1024 }
 0x34d   :  { %p814_p13 = scmp.ne.s32.totalorder %s1080_s7, %s813_s1  ;;  %p817_p0 = scmp.lt.u32.totalorder %s813_s1, %s1080_s7 }
 0x34f   :  { %p819_p1 = pnand %p817_p0, %p814_p13 }
 0x351   :  { %822 = shalt.err (!%p819_p1)
}
 0x352   :  { %s835_s30 = smov 128   ;;  %s836_s8 = smov 8  }
 0x353   :  { %643 = dma.vmem_to_hbm [thread:$0]  %s638_s22, 1024, %s1080_s7, [#allocation4], %s835_s30, %s835_s30, %s836_s8  }
 0x354   :  { %825 = dma.done.wait [#allocation4], 1024  }
 0x355   :  { %826 = vsyncadd [#allocation4], 4294966272 }
 0x356   :  { %647 = vsyncpa [#allocation3], 1 }
 0x357   :  { %648 = vsyncpa [#allocation4], 1 }

</bundles_post_ra>
